<compile_context>
chip_gen: v6e
topology: v6e:2x2x1
jax: 0.10.0
libtpu: 0.0.40
codegen_flags: <defaults>
</compile_context>

<pallas_src>
import jax
import jax.numpy as jnp
import numpy as np
from jax.experimental import pallas as pl
from jax.experimental.pallas import tpu as pltpu


# ---------------------------------------------------------------- helpers ---

def _round_up(x, m):
    return (x + m - 1) // m * m


def _padded_block_bytes(shape, dtype):
    """VMEM bytes of one pipeline buffer for `shape`: last dim padded to 128
    lanes, second-to-last to the dtype sublane multiple."""
    itemsize = jnp.dtype(dtype).itemsize
    sub = {4: 8, 2: 16, 1: 32}.get(itemsize, 8)
    dims = list(shape)
    dims[-1] = _round_up(dims[-1], 128)
    if len(dims) >= 2:
        dims[-2] = _round_up(dims[-2], sub)
    total = 1
    for s in dims:
        total *= int(s)
    return total * itemsize


def _pick_batch_block(B, padded_row_bytes, per_buffer_budget):
    """Largest batch tile bb such that one x buffer stays under budget.

    If the whole batch fits, a single block is used (always layout-legal since
    every block dim equals the full array dim).  Otherwise bb is a multiple of
    128 (keeps the lane-dense (1, bb) output block legal) and the last, ragged
    block is handled by Pallas' masked edge handling — no host-side pad copy.
    """
    if _round_up(B, 8) * padded_row_bytes <= per_buffer_budget:
        return B
    if B <= 128:
        return B          # cannot legally tile the (1, B) output any finer
    bb = max(128, (per_buffer_budget // max(padded_row_bytes, 1)) // 128 * 128)
    return int(min(bb, (B // 128) * 128))


def _grid_semantics(num_blocks):
    if num_blocks <= 1:
        return ("arbitrary",)
    try:
        kind = jax.devices()[0].device_kind.lower()
    except Exception:       # pragma: no cover - defensive
        kind = ""
    if "v7" in kind:
        # v7x has two TensorCores per chip; CORE_PARALLEL actually shards the
        # independent batch axis across them (plain "parallel" is a codegen
        # no-op).  Single-TC chips keep "parallel".
        return (pltpu.CORE_PARALLEL,)
    return ("parallel",)


# ---------------------------------------------------------------- kernels ---

def _every_kernel(x_ref, g_ref, rep_ref, sel_ref, o_ref):
    """Per row: sum_h exp(-||x[b, h, off:] - goal[b]||_2), lane-dense layout.

    x_ref   : (bb, H*D) trajectory rows (native dtype, lane-dense)
    g_ref   : (bb, G)   goal rows (native dtype)
    rep_ref : (G, H*D)  0/1 replication matrix: goal[b, g] -> lane h*D+off+g
    sel_ref : (H*D, H)  0/1 masked segment-sum matrix (lanes with d < off are 0)
    o_ref   : (1, bb)   lane-dense scores
    """
    x = x_ref[...].astype(jnp.float32)
    g = g_ref[...].astype(jnp.float32)
    # Broadcast goal over the horizon on the (idle) MXU: (bb, G) @ (G, H*D).
    g_tiled = jnp.dot(g, rep_ref[...], preferred_element_type=jnp.float32)
    diff = x - g_tiled
    sq = diff * diff
    # Masked per-timestep reduction on the MXU: (bb, H*D) @ (H*D, H).
    sq_h = jnp.dot(sq, sel_ref[...], preferred_element_type=jnp.float32)
    # NB: sqrt(0) has an infinite gradient; clamp with an eps before sqrt if this
    # path is ever differentiated (forward value is exact either way).
    scores = jnp.sum(jnp.exp(-jnp.sqrt(sq_h)), axis=-1)       # (bb,)
    o_ref[...] = scores[None, :]                              # lane-dense (1, bb)


def _last_kernel(x_ref, g_ref, m_ref, o_ref):
    """Per row: exp(-||x[b, -1, 4:] - goal[b]||_2).

    x_ref : (bb, 1, D) last timestep only (BlockSpec-indexed, no wrapper slice)
    g_ref : (bb, D)    goal left-padded to D lanes
    m_ref : (1, D)     constant 0/1 lane mask (d >= 4)
    o_ref : (1, bb)
    """
    x = x_ref[...][:, 0, :].astype(jnp.float32)               # (bb, D)
    g = g_ref[...].astype(jnp.float32)                        # (bb, D)
    d = x - g
    sq = d * d * m_ref[...]                                   # 3 VPU ops / element
    dist = -jnp.sqrt(jnp.sum(sq, axis=-1))                    # (bb,)
    o_ref[...] = jnp.exp(dist)[None, :]


# ---------------------------------------------------------------- wrapper ---

def true_value_guided_vis(x, cond, t, *, func_type, horizon,
                          per_buffer_budget=2 << 20):
    """Pallas equivalent of TrueValueGuidedVis(func_type, horizon).forward(x, cond, t)."""
    del t                                           # unused by the reference forward
    goal = cond[horizon - 1]                        # (B, G)
    B, H, D = x.shape
    G = goal.shape[-1]
    itemsize = jnp.dtype(x.dtype).itemsize
    goal_itemsize = jnp.dtype(goal.dtype).itemsize

    if func_type == 'every':
        offset = 0 if D == G else 2
        assert D - offset == G, "goal dim must match x[..., offset:]"
        L = H * D
        x_in = x.reshape(B, L)                      # free: row-major (B,H,D)->(B,H*D)

        # Constant replication / masked-selector matrices (tiny, built host-side).
        lane = np.arange(L)
        d_of = lane % D
        h_of = lane // D
        rep = (d_of[None, :] == (np.arange(G)[:, None] + offset)).astype(np.float32)
        sel = ((h_of[:, None] == np.arange(H)[None, :])
               & (d_of[:, None] >= offset)).astype(np.float32)
        rep = jnp.asarray(rep)                      # (G, L)
        sel = jnp.asarray(sel)                      # (L, H)

        padded_row_bytes = _round_up(L, 128) * itemsize
        bb = _pick_batch_block(B, padded_row_bytes, per_buffer_budget)
        num_blocks = int(pl.cdiv(B, bb))

        kernel = _every_kernel
        args = (x_in, goal, rep, sel)
        in_specs = [
            pl.BlockSpec((bb, L), lambda i: (i, 0)),
            pl.BlockSpec((bb, G), lambda i: (i, 0)),
            pl.BlockSpec((G, L), lambda i: (0, 0)),   # resident: index never changes
            pl.BlockSpec((L, H), lambda i: (0, 0)),
        ]
        block_list = [((bb, L), x.dtype), ((bb, G), goal.dtype),
                      ((G, L), jnp.float32), ((L, H), jnp.float32),
                      ((1, bb), jnp.float32)]
        cost = pl.CostEstimate(
            flops=int(2 * B * L + 2 * B * G * L + 2 * B * L * H + 2 * B * H),
            transcendentals=int(2 * B * H),
            bytes_accessed=int(B * L * itemsize + B * G * goal_itemsize
                               + (G * L + L * H) * 4 + B * 4))

    elif func_type == 'last':
        # forward() passes x[..., 2:] and last_value slices [:, -1, 2:] again,
        # so the effective comparison is x[:, -1, 4:] vs goal.
        offset = 4
        assert D - offset == G, "goal dim must match x[:, -1, 4:]"
        goal_pad = jnp.pad(goal, ((0, 0), (offset, 0)))                 # (B, D), tiny
        mask = jnp.asarray((np.arange(D) >= offset).astype(np.float32))[None, :]

        padded_row_bytes = 8 * _round_up(D, 128) * itemsize             # (1, D) slab
        bb = _pick_batch_block(B, padded_row_bytes, per_buffer_budget)
        num_blocks = int(pl.cdiv(B, bb))

        kernel = _last_kernel
        args = (x, goal_pad, mask)
        in_specs = [
            pl.BlockSpec((bb, 1, D), lambda i: (i, H - 1, 0)),          # last timestep
            pl.BlockSpec((bb, D), lambda i: (i, 0)),
            pl.BlockSpec((1, D), lambda i: (0, 0)),
        ]
        block_list = [((bb, 1, D), x.dtype), ((bb, D), goal_pad.dtype),
                      ((1, D), jnp.float32), ((1, bb), jnp.float32)]
        cost = pl.CostEstimate(
            flops=int(4 * B * D),
            transcendentals=int(2 * B),
            bytes_accessed=int(2 * B * D * itemsize + D * 4 + B * 4))
    else:
        raise ValueError(func_type)

    # Padded-byte VMEM accounting: 2 pipeline buffers per operand + headroom.
    needed = 2 * sum(_padded_block_bytes(s, d) for s, d in block_list)
    vmem_limit = int(min(max(needed + (2 << 20), 16 << 20), 128 << 20))

    out = pl.pallas_call(
        kernel,
        out_shape=jax.ShapeDtypeStruct((1, B), jnp.float32),
        grid=(num_blocks,),
        in_specs=in_specs,
        out_specs=pl.BlockSpec((1, bb), lambda i: (0, i)),    # lane-dense output
        compiler_params=pltpu.CompilerParams(
            dimension_semantics=_grid_semantics(num_blocks),
            vmem_limit_bytes=vmem_limit),
        cost_estimate=cost,
    )(*args)

    row_score = out[0]                              # (B,)
    # torch's row_score.squeeze(dim=-1): only squeezes if that dim has size 1.
    if row_score.shape[-1] == 1:
        row_score = jnp.squeeze(row_score, axis=-1)
    return row_score


# -------------------------------------------------------- pure-JAX reference

def _ref_forward(x, cond, func_type, horizon):
    goal = cond[horizon - 1]
    if func_type == 'every':
        gp = jnp.tile(goal[:, None, :], (1, x.shape[1], 1))
        if x.shape == gp.shape:
            dist = -jnp.linalg.norm(x - gp, axis=-1)
        else:
            dist = -jnp.linalg.norm(x[..., 2:] - gp, axis=-1)
        rs = jnp.exp(dist).sum(-1)
    else:  # 'last'
        traj = x[..., 2:]
        dist = -jnp.linalg.norm(traj[:, -1, 2:] - goal, axis=-1)
        rs = jnp.exp(dist)
    if rs.shape[-1] == 1:
        rs = jnp.squeeze(rs, axis=-1)
    return rs


# -------------------------------------------------------------------- main --

if __name__ == "__main__":
    B, H, D = 2, 8, 6          # batch, horizon, obs-dim (first 2 dims are "xy")
    horizon = H
    key = jax.random.PRNGKey(0)
    kx, kg1, kg2, kg3, kx2, kg4 = jax.random.split(key, 6)

    x = jax.random.normal(kx, (B, H, D), dtype=jnp.float32)
    t = jnp.zeros((B,), dtype=jnp.int32)            # unused by forward

    # func_type == 'every': goal dim = D - 2 (comparison against x[..., 2:])
    cond_every = {horizon - 1: jax.random.normal(kg1, (B, D - 2), jnp.float32)}
    out_every = true_value_guided_vis(
        x, cond_every, t, func_type='every', horizon=horizon)
    ref_every = _ref_forward(x, cond_every, 'every', horizon)

    # func_type == 'every', goal dim = D (shapes match -> no lane offset)
    cond_full = {horizon - 1: jax.random.normal(kg3, (B, D), jnp.float32)}
    out_full = true_value_guided_vis(
        x, cond_full, t, func_type='every', horizon=horizon)
    ref_full = _ref_forward(x, cond_full, 'every', horizon)

    # func_type == 'last': goal dim = D - 4 (comparison against x[:, -1, 4:])
    cond_last = {horizon - 1: jax.random.normal(kg2, (B, D - 4), jnp.float32)}
    out_last = true_value_guided_vis(
        x, cond_last, t, func_type='last', horizon=horizon)
    ref_last = _ref_forward(x, cond_last, 'last', horizon)

    # Exercise the tiled path (grid > 1, ragged last block) with a tiny budget.
    B2 = 200
    x2 = jax.random.normal(kx2, (B2, H, D), dtype=jnp.float32)
    t2 = jnp.zeros((B2,), dtype=jnp.int32)
    cond_tiled = {horizon - 1: jax.random.normal(kg4, (B2, D - 2), jnp.float32)}
    out_tiled = true_value_guided_vis(
        x2, cond_tiled, t2, func_type='every', horizon=horizon,
        per_buffer_budget=64 * 1024)
    ref_tiled = _ref_forward(x2, cond_tiled, 'every', horizon)

    jax.block_until_ready((out_every, out_full, out_last, out_tiled))

    # 'every' tolerances allow for MXU f32 multi-pass accumulation in the two
    # segmented-reduce matmuls (typically agrees to ~1e-6); structural errors
    # (wrong offset / mask / lane mapping) would be orders of magnitude larger.
    np.testing.assert_allclose(np.asarray(out_every), np.asarray(ref_every),
                               rtol=5e-3, atol=1e-5)
    np.testing.assert_allclose(np.asarray(out_full), np.asarray(ref_full),
                               rtol=5e-3, atol=1e-5)
    np.testing.assert_allclose(np.asarray(out_tiled), np.asarray(ref_tiled),
                               rtol=5e-3, atol=1e-5)
    # 'last' has no matmul: exact f32.
    np.testing.assert_allclose(np.asarray(out_last), np.asarray(ref_last),
                               rtol=1e-5, atol=1e-5)

    print("KERNEL_OK")
</pallas_src>

<mosaic_0001>
module attributes {stable_mosaic.version = 11 : i64} {
  func.func @_every_kernel(%arg0: i32, %arg1: memref<2x48xf32, #tpu.memory_space<vmem>>, %arg2: memref<2x4xf32, #tpu.memory_space<vmem>>, %arg3: memref<4x48xf32, #tpu.memory_space<vmem>>, %arg4: memref<48x8xf32, #tpu.memory_space<vmem>>, %arg5: memref<1x2xf32, #tpu.memory_space<vmem>>) attributes {dimension_semantics = [#tpu.dimension_semantics<arbitrary>], iteration_bounds = array<i64: 1>, scalar_prefetch = 0 : i64, scratch_operands = 0 : i64, tpu.core_type = #tpu.core_type<tc>, window_params = [{transform_indices = @transform_0, window_bounds = array<i64: 2, 48>}, {transform_indices = @transform_1, window_bounds = array<i64: 2, 4>}, {pipeline_mode = #tpu.pipeline_mode<synchronous>, transform_indices = @transform_2, window_bounds = array<i64: 4, 48>}, {pipeline_mode = #tpu.pipeline_mode<synchronous>, transform_indices = @transform_3, window_bounds = array<i64: 48, 8>}, {transform_indices = @transform_4, window_bounds = array<i64: 1, 2>}]} {
    %c0 = arith.constant 0 : index
    %c0_0 = arith.constant 0 : index
    %0 = vector.load %arg1[%c0, %c0_0] : memref<2x48xf32, #tpu.memory_space<vmem>>, vector<2x48xf32>
    %c0_1 = arith.constant 0 : index
    %c0_2 = arith.constant 0 : index
    %1 = vector.load %arg2[%c0_1, %c0_2] : memref<2x4xf32, #tpu.memory_space<vmem>>, vector<2x4xf32>
    %c0_3 = arith.constant 0 : index
    %c0_4 = arith.constant 0 : index
    %2 = vector.load %arg3[%c0_3, %c0_4] : memref<4x48xf32, #tpu.memory_space<vmem>>, vector<4x48xf32>
    %cst = arith.constant dense<0.000000e+00> : vector<2x48xf32>
    %3 = tpu.matmul %1, %2, %cst {dimension_numbers = #tpu.dot_dimension_numbers<[1], [0], [0], [1], [0, 0, 1, 1], [], []>} : vector<2x4xf32>, vector<4x48xf32>, vector<2x48xf32> -> vector<2x48xf32>
    %4 = arith.subf %0, %3 : vector<2x48xf32>
    %5 = arith.mulf %4, %4 : vector<2x48xf32>
    %c0_5 = arith.constant 0 : index
    %c0_6 = arith.constant 0 : index
    %6 = vector.load %arg4[%c0_5, %c0_6] : memref<48x8xf32, #tpu.memory_space<vmem>>, vector<48x8xf32>
    %cst_7 = arith.constant dense<0.000000e+00> : vector<2x8xf32>
    %7 = tpu.matmul %5, %6, %cst_7 {dimension_numbers = #tpu.dot_dimension_numbers<[1], [0], [0], [1], [0, 0, 1, 1], [], []>} : vector<2x48xf32>, vector<48x8xf32>, vector<2x8xf32> -> vector<2x8xf32>
    %8 = math.sqrt %7 : vector<2x8xf32>
    %cst_8 = arith.constant 0.000000e+00 : f32
    %9 = vector.broadcast %cst_8 : f32 to vector<2x8xf32>
    %10 = arith.subf %9, %8 : vector<2x8xf32>
    %11 = math.exp %10 : vector<2x8xf32>
    %cst_9 = arith.constant dense<0.000000e+00> : vector<2xf32>
    %12 = vector.multi_reduction <add>, %11, %cst_9 [1] : vector<2x8xf32> to vector<2xf32>
    %13 = vector.shape_cast %12 : vector<2xf32> to vector<1x2xf32>
    %c0_10 = arith.constant 0 : index
    %c0_11 = arith.constant 0 : index
    %14 = vector.load %arg5[%c0_10, %c0_11] : memref<1x2xf32, #tpu.memory_space<vmem>>, vector<1x2xf32>
    tpu.vector_store %arg5[%c0_10, %c0_11], %13 {strides = array<i32>} : memref<1x2xf32, #tpu.memory_space<vmem>>, vector<1x2xf32>,
    return
  }
  func.func @transform_0(%arg0: i32) -> (i32, i32) {
    %c0_i32 = arith.constant 0 : i32
    %c0_i32_0 = arith.constant 0 : i32
    return %arg0, %c0_i32 : i32, i32
  }
  func.func @transform_1(%arg0: i32) -> (i32, i32) {
    %c0_i32 = arith.constant 0 : i32
    %c0_i32_0 = arith.constant 0 : i32
    return %arg0, %c0_i32 : i32, i32
  }
  func.func @transform_2(%arg0: i32) -> (i32, i32) {
    %c0_i32 = arith.constant 0 : i32
    %c0_i32_0 = arith.constant 0 : i32
    %c0_i32_1 = arith.constant 0 : i32
    return %c0_i32, %c0_i32_0 : i32, i32
  }
  func.func @transform_3(%arg0: i32) -> (i32, i32) {
    %c0_i32 = arith.constant 0 : i32
    %c0_i32_0 = arith.constant 0 : i32
    %c0_i32_1 = arith.constant 0 : i32
    return %c0_i32, %c0_i32_0 : i32, i32
  }
  func.func @transform_4(%arg0: i32) -> (i32, i32) {
    %c0_i32 = arith.constant 0 : i32
    %c0_i32_0 = arith.constant 0 : i32
    return %c0_i32, %arg0 : i32, i32
  }
}

</mosaic_0001>

<bundles_post_ra>
// kernel: tpu_custom_call.1
= control target key start
LH: loop header
LB: loop body
LE: loop exit
PB: predicated region body
PF: predicated region fallthrough
CT: control target
= control target key end

     0   :  { %vm25_vm0 = vcmask 1043456   ;;  %vm21_vm1 = vcmask 31744   ;;  %v280_v1 = vmov 0.0   ;;  %vm281_vm2 = vmmov 0   ;;  %s338_s0 = inlined_call_operand.vmem [shape: f32[2,48], index: 0, kind: input, shape index: {}]   ;;  %s339_s1 = inlined_call_operand.vmem [shape: f32[2,4], index: 1, kind: input, shape index: {}]   ;;  %s340_s2 = inlined_call_operand.vmem [shape: f32[4,48], index: 2, kind: input, shape index: {}]   ;;  %s341_s3 = inlined_call_operand.vmem [shape: f32[48,8], index: 3, kind: input, shape index: {}]   ;;  %s342_s4 = inlined_call_operand.hbm [shape: f32[1,2], index: 4, kind: output, shape index: {}]  }
   0x1   :  { %v20_v0 = vld [vmem:[%s340_s2] sm:$0xf]  ;;  %231 = vmatprep.subr.mxu0 %v280_v1  ;;  %233 = vmatprep.mubr.msk.f32.mxu0 %vm281_vm2, %v280_v1  ;;  %v106_v3 = vld [vmem:[%s341_s3 + $0x28] sm:$0xff] }
   0x2   :  { %v19_v2 = vld [vmem:[%s339_s1] sm:$0x3]  ;;  %232 = vmatpush3.msk.msra.mxu0 %vm25_vm0, %v20_v0  ;;  %236 = vmatprep.subr.mxu1 %v280_v1 }
   0x3   :  { %v105_v4 = vld [vmem:[%s341_s3 + $0x20] sm:$0xff] }
   0x4   :  { %9 = vsyncpa [#allocation3], 0  ;;  %234 = vmatmul.mubr.msk.f32.vlgmr.msra.gmra.mxu0 %vm21_vm1, %v19_v2  ;;  %237 = vmatpush3.msra.mxu1 %v106_v3  ;;  %v104_v5 = vld [vmem:[%s341_s3 + $0x18] sm:$0xff]  ;;  %v103_v6 = vld [vmem:[%s341_s3 + $0x10] sm:$0xff]  ;;  %vm107_vm3 = vcmask 392192   ;;  %vm191_vm6 = vcmask 58368   ;;  %v196_v25 = vlaneseq }
   0x5   :  { %238 = vmatprep.subr.mxu1 %v280_v1  ;;  %248 = vmatprep.mubr.msk.f32.mxu1 %vm281_vm2, %v280_v1  ;;  %v102_v7 = vld [vmem:[%s341_s3 + $0x8] sm:$0xff]  ;;  %v101_v8 = vld [vmem:[%s341_s3] sm:$0xff]  ;;  %vm203_vm7 = vcmask 8192  }
   0x6   :  { %239 = vmatpush3.msra.mxu1 %v105_v4  ;;  %v18_v9 = vld [vmem:[%s338_s0] sm:$0x3]  ;;  %v197_v26 = vand.u32 127, %v196_v25  ;;  %v199_v27 = vshrl.u32 %v196_v25, 7  ;;  %s282_s0 = smov [#allocation2]  }
   0x7   :  { %240 = vmatprep.subr.mxu1 %v280_v1  ;;  %s211_s3 = sshll.u32 %s282_s0, 4  ;;  %s212_s3 = int_to_ptr.vmem [resolvable:$true] %s211_s3 }
   0x8   :  { %241 = vmatpush3.msra.mxu1 %v104_v5  ;;  %v200_v28 = vsub.s32 %v197_v26, %v199_v27  ;;  %s258_s5 = scalar_lea.vmem %s212_s3, 16  ;;  %s262_s6 = scalar_lea.vmem %s212_s3, 32 }
   0x9   :  { %242 = vmatprep.subr.mxu1 %v280_v1  ;;  %p259_p0 = scmp.ne.s32.totalorder %s212_s3, %s258_s5  ;;  %p263_p1 = scmp.lt.s32.totalorder %s212_s3, %s212_s3 }
   0xa   :  { %243 = vmatpush3.msra.mxu1 %v103_v6  ;;  %p264_p2 = scmp.lt.s32.totalorder %s262_s6, %s258_s5 }
   0xb   :  { %244 = vmatprep.subr.mxu1 %v280_v1 }
   0xc   :  { %245 = vmatpush3.msra.mxu1 %v102_v7  ;;  %p265_p3 = por %p264_p2, %p263_p1 }
   0xd   :  { %246 = vmatprep.subr.mxu1 %v280_v1 }
   0xe   :  { %247 = vmatpush3.msra.mxu1 %v101_v8  ;;  %p266_p4 = pnand %p265_p3, %p259_p0 }
  0xc4   :  { %v95_v10 = vpop.f32.mrf.mxu0 }
  0xc5   :  { %v99_v11 = vsub.f32 %v18_v9, %v95_v10 }
  0xc6   :  { %v235_v12 = vpop.f32.mrf.mxu0 }
  0xc7   :  { %v100_v13 = vmul.f32 %v99_v11, %v99_v11 }
  0xc9   :  { %249 = vmatmul.mubr.msk.f32.vlgmr.msra.gmra.mxu1 %vm107_vm3, %v100_v13 }
 0x189   :  { %v177_v14 = vpop.f32.mrf.mxu1 }
 0x18a   :  { %254 = vrsqrt.f32 %v177_v14  ;;  %vm183_vm4 = vcmp.eq.f32.partialorder %v177_v14, inf  ;;  %v186_v18 = vand.u32 2147483648, %v177_v14  ;;  %vm185_vm5 = vcmp.eq.f32.partialorder %v177_v14, 0.0 }
 0x18b   :  { %v250_v15 = vpop.f32.mrf.mxu1 }
 0x197   :  { %v255_v16 = vpop.eup %254 }
 0x198   :  { %v182_v17 = vmul.f32 %v255_v16, %v177_v14 }
 0x19a   :  { %v184_v19 = vsel %vm183_vm4, %v177_v14, %v182_v17 }
 0x19b   :  { %v187_v20 = vsel %vm185_vm5, %v186_v18, %v184_v19 }
 0x19c   :  { %v188_v21 = vsub.f32 0.0, %v187_v20 }
 0x19e   :  { %v189_v22 = vmul.f32 1.442695, %v188_v21 }
 0x1a0   :  { %256 = vpow2.f32 %v189_v22 }
 0x1ad   :  { %v257_v23 = vpop.eup %256 }
 0x1ae   :  { %v192_v24 = vsel %vm191_vm6, %v257_v23, 0.0 }
 0x1af   :  { %193 = vadd.xlane.f32.xlu0 %v192_v24 }
 0x238   :  { %v194_v29 = vpop.xlane.xlu0 %193 }
 0x239   :  { %v201_v30 = vrot.slane %v194_v29, %v200_v28 }
 0x23b   :  { %204 = vst.msk [vmem:[#allocation2] sm:$0x1] %vm203_vm7, %v201_v30 }
 0x23c   :  { %269 = shalt.err (!%p266_p4)
}
 0x23d   :  { %214 = dma.vmem_to_hbm [thread:$0]  %s212_s3, 16, %s342_s4, [#allocation3]  }
 0x23e   :  { %278 = dma.done.wait [#allocation3], 16  }
 0x23f   :  { %279 = vsyncadd [#allocation3], 4294967280 }
 0x240   :  { %218 = vsyncpa [#allocation3], 1 }

</bundles_post_ra>
